<compile_context>
chip_gen: v6e
topology: v6e:2x2x1
jax: 0.10.0
libtpu: 0.0.40
codegen_flags: <defaults>
</compile_context>

<pallas_src>
import functools

import jax
import jax.numpy as jnp
import numpy as np
from jax.experimental import pallas as pl
from jax.experimental.pallas import tpu as pltpu

LANES = 128          # all feature/hidden dims padded to a full lane width
SUBLANES_BF16 = 16   # bf16 row-count alignment (sublane packing)


def _round_up(x, m):
    return (x + m - 1) // m * m


def _pad_to(x, shape, dtype):
    out = jnp.zeros(shape, dtype)
    idx = tuple(slice(0, s) for s in x.shape)
    return out.at[idx].set(x.astype(dtype))


# ----------------------------------------------------------------------------
# Kernel: one grid step == one independent chain.
#   c = 0 : gc1 -> gc3 -> drug_union     (ufea, VU_adj then UV_adj)
#   c = 1 : gc2 -> gc4 -> protein_union  (vfea, UV_adj then VU_adj)
# Per-chain operands are selected purely via BlockSpec index maps, so the body
# is chain-agnostic. With dimension_semantics=("parallel",) the two chains map
# onto v7x's two TensorCores; on v5e/v6e they simply iterate.
# ----------------------------------------------------------------------------
def _dgcn_chain_kernel(fea_ref, adj_a_ref, adj_b_ref, w_ref, b_ref, out_ref,
                       *, alpha):
    fea = fea_ref[0]                                      # (N, P) bf16

    def gcn(x, w, b, adj):
        # LeakyReLU( adj @ (x @ W) + b ), bf16 MXU inputs, f32 accumulation.
        xw = jnp.dot(x, w, preferred_element_type=jnp.float32)
        h = jnp.dot(adj, xw.astype(jnp.bfloat16),
                    preferred_element_type=jnp.float32) + b
        return jnp.maximum(h, alpha * h)                  # LeakyReLU (alpha < 1)

    ho = gcn(fea, w_ref[0], b_ref[0], adj_a_ref[0])       # first GCN
    ho = gcn(ho.astype(jnp.bfloat16), w_ref[1], b_ref[1], adj_b_ref[0])  # second

    # union(cat(ho, fea)) as two summed K=P dots -- no concat scratch buffer.
    out = (jnp.dot(ho.astype(jnp.bfloat16), w_ref[2],
                   preferred_element_type=jnp.float32)
           + jnp.dot(fea, w_ref[3], preferred_element_type=jnp.float32)
           + b_ref[2])
    out_ref[0] = jnp.maximum(out, 0.0)                    # ReLU


# ----------------------------------------------------------------------------
# One-time parameter packing: pad + pre-transpose + stack (off the hot path).
# Weight plane order per chain c: [4c+0]=first GCN W, [4c+1]=second GCN W,
# [4c+2]=union W (ho half), [4c+3]=union W (fea half).
# Bias plane order per chain c:   [3c+0], [3c+1] GCN biases, [3c+2] union bias.
# ----------------------------------------------------------------------------
def prepare_params(params, p=LANES):
    def pw(w):                      # (in, out) -> (P, P) bf16, zero-padded
        return _pad_to(w, (p, p), jnp.bfloat16)

    def pb(b):                      # (out,) -> (1, P) f32
        return _pad_to(b.reshape(1, -1), (1, p), jnp.float32)

    def union_halves(w):            # torch (F, 2F) -> (W.T[:F], W.T[F:]) padded
        f = w.shape[0]
        wt = jnp.transpose(w)       # (2F, F)
        return pw(wt[:f]), pw(wt[f:])

    wu0, wu1 = union_halves(params["wu"])
    wv0, wv1 = union_halves(params["wv"])
    w_stack = jnp.stack([pw(params["w1"]), pw(params["w3"]), wu0, wu1,
                         pw(params["w2"]), pw(params["w4"]), wv0, wv1])   # (8,P,P)
    b_stack = jnp.stack([pb(params["b1"]), pb(params["b3"]), pb(params["bu"]),
                         pb(params["b2"]), pb(params["b4"]), pb(params["bv"])])
    return {"w": w_stack, "b": b_stack}                                   # (6,1,P)


def prepare_graph(UV_adj, VU_adj, n_rows):
    # Static per graph: pad both adjacencies to (N, N) bf16 and stack so that
    # plane c is the FIRST adjacency of chain c ([0]=VU for drug, [1]=UV).
    return jnp.stack([_pad_to(VU_adj, (n_rows, n_rows), jnp.bfloat16),
                      _pad_to(UV_adj, (n_rows, n_rows), jnp.bfloat16)])


def prepare_features(ufea, vfea, n_rows, p=LANES):
    # Pad/cast once upstream of the forward: plane c is chain c's features.
    return jnp.stack([_pad_to(ufea, (n_rows, p), jnp.bfloat16),
                      _pad_to(vfea, (n_rows, p), jnp.bfloat16)])


# ----------------------------------------------------------------------------
# Forward: single pallas_call over a 2-wide "parallel" grid + output slicing.
# ----------------------------------------------------------------------------
@functools.partial(jax.jit, static_argnames=("alpha", "n_u", "n_v", "feature_dim"))
def dgcn_layer_forward(prep, fea_stack, adj_stack, *, alpha, n_u, n_v, feature_dim):
    _, N, P = fea_stack.shape

    flops = 2 * (8 * N * P * P + 4 * N * N * P)
    bytes_accessed = (fea_stack.size * 2 + 2 * adj_stack.size * 2
                      + prep["w"].size * 2 + prep["b"].size * 4
                      + 2 * N * P * 4)

    out = pl.pallas_call(
        functools.partial(_dgcn_chain_kernel, alpha=alpha),
        out_shape=jax.ShapeDtypeStruct((2, N, P), jnp.float32),
        grid=(2,),
        in_specs=[
            pl.BlockSpec((1, N, P), lambda c: (c, 0, 0)),       # chain features
            pl.BlockSpec((1, N, N), lambda c: (c, 0, 0)),       # first adjacency
            pl.BlockSpec((1, N, N), lambda c: (1 - c, 0, 0)),   # second adjacency
            pl.BlockSpec((4, P, P), lambda c: (c, 0, 0)),       # per-chain weights
            pl.BlockSpec((3, 1, P), lambda c: (c, 0, 0)),       # per-chain biases
        ],
        out_specs=pl.BlockSpec((1, N, P), lambda c: (c, 0, 0)),
        compiler_params=pltpu.CompilerParams(
            dimension_semantics=("parallel",),
            vmem_limit_bytes=32 * 1024 * 1024),
        cost_estimate=pl.CostEstimate(flops=flops, transcendentals=0,
                                      bytes_accessed=bytes_accessed),
    )(fea_stack, adj_stack, adj_stack, prep["w"], prep["b"])

    return out[0, :n_u, :feature_dim], out[1, :n_v, :feature_dim]


# ----------------------------------------------------------------------------
# Pure-JAX f32 reference (matches the PyTorch module semantics, eval mode).
# ----------------------------------------------------------------------------
def _ref_forward(params, ufea, vfea, UV_adj, VU_adj, alpha):
    def gcn_ref(x, w, b, adj):
        h = adj @ (x @ w) + b
        return jnp.where(h > 0, h, alpha * h)

    drug_ho = gcn_ref(ufea, params["w1"], params["b1"], VU_adj)
    protein_ho = gcn_ref(vfea, params["w2"], params["b2"], UV_adj)
    drug_ho = gcn_ref(drug_ho, params["w3"], params["b3"], UV_adj)
    protein_ho = gcn_ref(protein_ho, params["w4"], params["b4"], VU_adj)
    drug = jnp.concatenate([drug_ho, ufea], axis=1) @ params["wu"].T + params["bu"]
    protein = jnp.concatenate([protein_ho, vfea], axis=1) @ params["wv"].T + params["bv"]
    return jnp.maximum(drug, 0.0), jnp.maximum(protein, 0.0)


def init_params(key, feature_dim, hidden_dim):
    ks = jax.random.split(key, 8)

    def lin(k, fan_in, shape):
        return (jax.random.normal(k, shape, jnp.float32) / np.sqrt(fan_in)).astype(
            jnp.float32)

    return {
        # gc1 / gc2: feature -> hidden
        "w1": lin(ks[0], feature_dim, (feature_dim, hidden_dim)),
        "b1": jnp.zeros((hidden_dim,), jnp.float32),
        "w2": lin(ks[1], feature_dim, (feature_dim, hidden_dim)),
        "b2": jnp.zeros((hidden_dim,), jnp.float32),
        # gc3 / gc4: hidden -> feature
        "w3": lin(ks[2], hidden_dim, (hidden_dim, feature_dim)),
        "b3": jnp.zeros((feature_dim,), jnp.float32),
        "w4": lin(ks[3], hidden_dim, (hidden_dim, feature_dim)),
        "b4": jnp.zeros((feature_dim,), jnp.float32),
        # union linears: 2*feature -> feature (torch nn.Linear weight layout)
        "wu": lin(ks[4], 2 * feature_dim, (feature_dim, 2 * feature_dim)),
        "bu": lin(ks[5], 2 * feature_dim, (feature_dim,)),
        "wv": lin(ks[6], 2 * feature_dim, (feature_dim, 2 * feature_dim)),
        "bv": lin(ks[7], 2 * feature_dim, (feature_dim,)),
    }


if __name__ == "__main__":
    # Small shapes consistent with the module:
    #   n_drug=8, n_protein=16, feature_dim=32, hidden_dim=64, leakey=0.1
    n_u, n_v = 8, 16
    feature_dim, hidden_dim = 32, 64
    alpha = 0.1
    assert feature_dim <= LANES and hidden_dim <= LANES

    key = jax.random.PRNGKey(0)
    k_param, k_u, k_v, k_adj = jax.random.split(key, 4)

    params = init_params(k_param, feature_dim, hidden_dim)

    ufea = jax.random.normal(k_u, (n_u, feature_dim), jnp.float32)
    vfea = jax.random.normal(k_v, (n_v, feature_dim), jnp.float32)

    # Dense bipartite adjacency (sparse spmm adj densified), roughly row-normalized.
    UV_adj = (jax.random.uniform(k_adj, (n_u, n_v)) < 0.4).astype(jnp.float32)
    UV_adj = UV_adj / jnp.maximum(UV_adj.sum(axis=1, keepdims=True), 1.0)
    VU_adj = (jnp.transpose(UV_adj) > 0).astype(jnp.float32)
    VU_adj = VU_adj / jnp.maximum(VU_adj.sum(axis=1, keepdims=True), 1.0)

    # One-time prep (off the per-forward hot path).
    N = _round_up(max(n_u, n_v), SUBLANES_BF16)
    prep = prepare_params(params)
    adj_stack = prepare_graph(UV_adj, VU_adj, N)
    fea_stack = prepare_features(ufea, vfea, N)

    drug, protein = dgcn_layer_forward(
        prep, fea_stack, adj_stack,
        alpha=alpha, n_u=n_u, n_v=n_v, feature_dim=feature_dim)
    jax.block_until_ready((drug, protein))

    drug_ref, protein_ref = _ref_forward(params, ufea, vfea, UV_adj, VU_adj, alpha)
    # bf16 MXU inputs with f32 accumulation -> loose-but-meaningful tolerance.
    np.testing.assert_allclose(
        np.asarray(drug), np.asarray(drug_ref), rtol=5e-2, atol=5e-2)
    np.testing.assert_allclose(
        np.asarray(protein), np.asarray(protein_ref), rtol=5e-2, atol=5e-2)

    assert drug.shape == (n_u, feature_dim) and protein.shape == (n_v, feature_dim)
    print("KERNEL_OK")
</pallas_src>

<mosaic_0001>
module attributes {stable_mosaic.version = 11 : i64} {
  func.func @_dgcn_chain_kernel(%arg0: i32, %arg1: memref<1x16x128xbf16, #tpu.memory_space<vmem>>, %arg2: memref<1x16x16xbf16, #tpu.memory_space<vmem>>, %arg3: memref<1x16x16xbf16, #tpu.memory_space<vmem>>, %arg4: memref<4x128x128xbf16, #tpu.memory_space<vmem>>, %arg5: memref<3x1x128xf32, #tpu.memory_space<vmem>>, %arg6: memref<1x16x128xf32, #tpu.memory_space<vmem>>) attributes {dimension_semantics = [#tpu.dimension_semantics<parallel>], iteration_bounds = array<i64: 2>, scalar_prefetch = 0 : i64, scratch_operands = 0 : i64, tpu.core_type = #tpu.core_type<tc>, window_params = [{transform_indices = @transform_0, window_bounds = array<i64: 1, 16, 128>}, {transform_indices = @transform_1, window_bounds = array<i64: 1, 16, 16>}, {transform_indices = @transform_2, window_bounds = array<i64: 1, 16, 16>}, {transform_indices = @transform_3, window_bounds = array<i64: 4, 128, 128>}, {transform_indices = @transform_4, window_bounds = array<i64: 3, 1, 128>}, {transform_indices = @transform_5, window_bounds = array<i64: 1, 16, 128>}]} {
    %c0 = arith.constant 0 : index
    %c0_0 = arith.constant 0 : index
    %c0_1 = arith.constant 0 : index
    %0 = vector.load %arg1[%c0, %c0_0, %c0_1] : memref<1x16x128xbf16, #tpu.memory_space<vmem>>, vector<1x16x128xbf16>
    %1 = vector.shape_cast %0 : vector<1x16x128xbf16> to vector<16x128xbf16>
    %c0_2 = arith.constant 0 : index
    %c0_3 = arith.constant 0 : index
    %c0_4 = arith.constant 0 : index
    %2 = vector.load %arg4[%c0_2, %c0_3, %c0_4] : memref<4x128x128xbf16, #tpu.memory_space<vmem>>, vector<1x128x128xbf16>
    %3 = vector.shape_cast %2 : vector<1x128x128xbf16> to vector<128x128xbf16>
    %c0_5 = arith.constant 0 : index
    %c0_6 = arith.constant 0 : index
    %c0_7 = arith.constant 0 : index
    %4 = vector.load %arg5[%c0_5, %c0_6, %c0_7] : memref<3x1x128xf32, #tpu.memory_space<vmem>>, vector<1x1x128xf32>
    %5 = vector.shape_cast %4 : vector<1x1x128xf32> to vector<1x128xf32>
    %c0_8 = arith.constant 0 : index
    %c0_9 = arith.constant 0 : index
    %c0_10 = arith.constant 0 : index
    %6 = vector.load %arg2[%c0_8, %c0_9, %c0_10] : memref<1x16x16xbf16, #tpu.memory_space<vmem>>, vector<1x16x16xbf16>
    %7 = vector.shape_cast %6 : vector<1x16x16xbf16> to vector<16x16xbf16>
    %cst = arith.constant dense<0.000000e+00> : vector<16x128xf32>
    %8 = tpu.matmul %1, %3, %cst {dimension_numbers = #tpu.dot_dimension_numbers<[1], [0], [0], [1], [0, 0, 1, 1], [], []>} : vector<16x128xbf16>, vector<128x128xbf16>, vector<16x128xf32> -> vector<16x128xf32>
    %9 = arith.truncf %8 : vector<16x128xf32> to vector<16x128xbf16>
    %cst_11 = arith.constant dense<0.000000e+00> : vector<16x128xf32>
    %10 = tpu.matmul %7, %9, %cst_11 {dimension_numbers = #tpu.dot_dimension_numbers<[1], [0], [0], [1], [0, 0, 1, 1], [], []>} : vector<16x16xbf16>, vector<16x128xbf16>, vector<16x128xf32> -> vector<16x128xf32>
    %11 = vector.broadcast %5 : vector<1x128xf32> to vector<16x128xf32>
    %12 = arith.addf %10, %11 : vector<16x128xf32>
    %cst_12 = arith.constant 1.000000e-01 : f32
    %13 = vector.broadcast %cst_12 : f32 to vector<16x128xf32>
    %14 = arith.mulf %13, %12 : vector<16x128xf32>
    %15 = arith.maximumf %12, %14 : vector<16x128xf32>
    %16 = arith.truncf %15 : vector<16x128xf32> to vector<16x128xbf16>
    %c1 = arith.constant 1 : index
    %c0_13 = arith.constant 0 : index
    %c0_14 = arith.constant 0 : index
    %17 = vector.load %arg4[%c1, %c0_13, %c0_14] : memref<4x128x128xbf16, #tpu.memory_space<vmem>>, vector<1x128x128xbf16>
    %18 = vector.shape_cast %17 : vector<1x128x128xbf16> to vector<128x128xbf16>
    %c1_15 = arith.constant 1 : index
    %c0_16 = arith.constant 0 : index
    %c0_17 = arith.constant 0 : index
    %19 = vector.load %arg5[%c1_15, %c0_16, %c0_17] : memref<3x1x128xf32, #tpu.memory_space<vmem>>, vector<1x1x128xf32>
    %20 = vector.shape_cast %19 : vector<1x1x128xf32> to vector<1x128xf32>
    %c0_18 = arith.constant 0 : index
    %c0_19 = arith.constant 0 : index
    %c0_20 = arith.constant 0 : index
    %21 = vector.load %arg3[%c0_18, %c0_19, %c0_20] : memref<1x16x16xbf16, #tpu.memory_space<vmem>>, vector<1x16x16xbf16>
    %22 = vector.shape_cast %21 : vector<1x16x16xbf16> to vector<16x16xbf16>
    %cst_21 = arith.constant dense<0.000000e+00> : vector<16x128xf32>
    %23 = tpu.matmul %16, %18, %cst_21 {dimension_numbers = #tpu.dot_dimension_numbers<[1], [0], [0], [1], [0, 0, 1, 1], [], []>} : vector<16x128xbf16>, vector<128x128xbf16>, vector<16x128xf32> -> vector<16x128xf32>
    %24 = arith.truncf %23 : vector<16x128xf32> to vector<16x128xbf16>
    %cst_22 = arith.constant dense<0.000000e+00> : vector<16x128xf32>
    %25 = tpu.matmul %22, %24, %cst_22 {dimension_numbers = #tpu.dot_dimension_numbers<[1], [0], [0], [1], [0, 0, 1, 1], [], []>} : vector<16x16xbf16>, vector<16x128xbf16>, vector<16x128xf32> -> vector<16x128xf32>
    %26 = vector.broadcast %20 : vector<1x128xf32> to vector<16x128xf32>
    %27 = arith.addf %25, %26 : vector<16x128xf32>
    %cst_23 = arith.constant 1.000000e-01 : f32
    %28 = vector.broadcast %cst_23 : f32 to vector<16x128xf32>
    %29 = arith.mulf %28, %27 : vector<16x128xf32>
    %30 = arith.maximumf %27, %29 : vector<16x128xf32>
    %31 = arith.truncf %30 : vector<16x128xf32> to vector<16x128xbf16>
    %c2 = arith.constant 2 : index
    %c0_24 = arith.constant 0 : index
    %c0_25 = arith.constant 0 : index
    %32 = vector.load %arg4[%c2, %c0_24, %c0_25] : memref<4x128x128xbf16, #tpu.memory_space<vmem>>, vector<1x128x128xbf16>
    %33 = vector.shape_cast %32 : vector<1x128x128xbf16> to vector<128x128xbf16>
    %cst_26 = arith.constant dense<0.000000e+00> : vector<16x128xf32>
    %34 = tpu.matmul %31, %33, %cst_26 {dimension_numbers = #tpu.dot_dimension_numbers<[1], [0], [0], [1], [0, 0, 1, 1], [], []>} : vector<16x128xbf16>, vector<128x128xbf16>, vector<16x128xf32> -> vector<16x128xf32>
    %c3 = arith.constant 3 : index
    %c0_27 = arith.constant 0 : index
    %c0_28 = arith.constant 0 : index
    %35 = vector.load %arg4[%c3, %c0_27, %c0_28] : memref<4x128x128xbf16, #tpu.memory_space<vmem>>, vector<1x128x128xbf16>
    %36 = vector.shape_cast %35 : vector<1x128x128xbf16> to vector<128x128xbf16>
    %cst_29 = arith.constant dense<0.000000e+00> : vector<16x128xf32>
    %37 = tpu.matmul %1, %36, %cst_29 {dimension_numbers = #tpu.dot_dimension_numbers<[1], [0], [0], [1], [0, 0, 1, 1], [], []>} : vector<16x128xbf16>, vector<128x128xbf16>, vector<16x128xf32> -> vector<16x128xf32>
    %38 = arith.addf %34, %37 : vector<16x128xf32>
    %c2_30 = arith.constant 2 : index
    %c0_31 = arith.constant 0 : index
    %c0_32 = arith.constant 0 : index
    %39 = vector.load %arg5[%c2_30, %c0_31, %c0_32] : memref<3x1x128xf32, #tpu.memory_space<vmem>>, vector<1x1x128xf32>
    %40 = vector.shape_cast %39 : vector<1x1x128xf32> to vector<1x128xf32>
    %41 = vector.broadcast %40 : vector<1x128xf32> to vector<16x128xf32>
    %42 = arith.addf %38, %41 : vector<16x128xf32>
    %cst_33 = arith.constant 0.000000e+00 : f32
    %43 = vector.broadcast %cst_33 : f32 to vector<16x128xf32>
    %44 = arith.maximumf %42, %43 : vector<16x128xf32>
    %c0_34 = arith.constant 0 : index
    %c0_35 = arith.constant 0 : index
    %c0_36 = arith.constant 0 : index
    %45 = vector.load %arg6[%c0_34, %c0_35, %c0_36] : memref<1x16x128xf32, #tpu.memory_space<vmem>>, vector<1x16x128xf32>
    %46 = vector.shape_cast %45 : vector<1x16x128xf32> to vector<16x128xf32>
    %47 = vector.shape_cast %44 : vector<16x128xf32> to vector<1x16x128xf32>
    tpu.vector_store %arg6[%c0_34, %c0_35, %c0_36], %47 {strides = array<i32>} : memref<1x16x128xf32, #tpu.memory_space<vmem>>, vector<1x16x128xf32>,
    return
  }
  func.func @transform_0(%arg0: i32) -> (i32, i32, i32) {
    %c0_i32 = arith.constant 0 : i32
    %c0_i32_0 = arith.constant 0 : i32
    %c0_i32_1 = arith.constant 0 : i32
    return %arg0, %c0_i32, %c0_i32_0 : i32, i32, i32
  }
  func.func @transform_1(%arg0: i32) -> (i32, i32, i32) {
    %c0_i32 = arith.constant 0 : i32
    %c0_i32_0 = arith.constant 0 : i32
    %c0_i32_1 = arith.constant 0 : i32
    return %arg0, %c0_i32, %c0_i32_0 : i32, i32, i32
  }
  func.func @transform_2(%arg0: i32) -> (i32, i32, i32) {
    %c1_i32 = arith.constant 1 : i32
    %0 = arith.subi %c1_i32, %arg0 : i32
    %c0_i32 = arith.constant 0 : i32
    %c0_i32_0 = arith.constant 0 : i32
    %c0_i32_1 = arith.constant 0 : i32
    return %0, %c0_i32, %c0_i32_0 : i32, i32, i32
  }
  func.func @transform_3(%arg0: i32) -> (i32, i32, i32) {
    %c0_i32 = arith.constant 0 : i32
    %c0_i32_0 = arith.constant 0 : i32
    %c0_i32_1 = arith.constant 0 : i32
    return %arg0, %c0_i32, %c0_i32_0 : i32, i32, i32
  }
  func.func @transform_4(%arg0: i32) -> (i32, i32, i32) {
    %c0_i32 = arith.constant 0 : i32
    %c0_i32_0 = arith.constant 0 : i32
    %c0_i32_1 = arith.constant 0 : i32
    return %arg0, %c0_i32, %c0_i32_0 : i32, i32, i32
  }
  func.func @transform_5(%arg0: i32) -> (i32, i32, i32) {
    %c0_i32 = arith.constant 0 : i32
    %c0_i32_0 = arith.constant 0 : i32
    %c0_i32_1 = arith.constant 0 : i32
    return %arg0, %c0_i32, %c0_i32_0 : i32, i32, i32
  }
}

</mosaic_0001>

<bundles_post_ra>
// kernel: dgcn_layer_forward.1
= control target key start
LH: loop header
LB: loop body
LE: loop exit
PB: predicated region body
PF: predicated region fallthrough
CT: control target
= control target key end

     0   :  { %s2209_s0 = inlined_call_operand.hbm [shape: bf16[2,16,128], index: 0, kind: input, shape index: {}]   ;;  %s2210_s1 = inlined_call_operand.hbm [shape: bf16[2,16,16], index: 1, kind: input, shape index: {}, may-alias: {1,2}]   ;;  %s2211_s2 = inlined_call_operand.hbm [shape: bf16[2,16,16], index: 2, kind: input, shape index: {}, may-alias: {1,2}]   ;;  %s2212_s3 = inlined_call_operand.hbm [shape: bf16[8,128,128], index: 3, kind: input, shape index: {}]   ;;  %s2213_s4 = inlined_call_operand.hbm [shape: f32[6,1,128], index: 4, kind: input, shape index: {}]   ;;  %s2214_s5 = inlined_call_operand.vmem [shape: f32[2,16,128], index: 5, kind: output, shape index: {}]  }
   0x1   :  { %2232 = sst [smem:[#allocation17_spill]] %s2209_s0 }
   0x2   :  { %2233 = sst [smem:[#allocation18_spill]] %s2210_s1 }
   0x3   :  { %2234 = sst [smem:[#allocation19_spill]] %s2212_s3 }
   0x4   :  { %10 = vsyncpa [#allocation3], 0 }
   0x5   :  { %12 = vsyncpa [#allocation3 + $0x1], 0 }
   0x6   :  { %13 = vsyncpa [#allocation5], 0 }
   0x7   :  { %15 = vsyncpa [#allocation5 + $0x1], 0 }
   0x8   :  { %16 = vsyncpa [#allocation8], 0 }
   0x9   :  { %18 = vsyncpa [#allocation8 + $0x1], 0  ;;  %s1769_s18 = smov 0   ;;  %s1771_s19 = smov 0  }
   0xa   :  { %s1773_s20 = smov 0   ;;  %s1775_s21 = smov 0  }
   0xb   :  { %s1777_s22 = smov 0   ;;  %s1779_s23 = smov 0  }
   0xc   :  { %s1781_s24 = smov 0  }
   0xd LB: > { %2235 = sst [smem:[#allocation14_spill]] %s1722_s23  ;;  %s1803_s25 = sadd.s32 4294967295, %s1726_s24   ;;  %s1726_s24 = sphi %s1781_s24, %s2262_s24   ;;  %s1722_s23 = sphi %s1779_s23, %s2264_s23   ;;  %s1718_s22 = sphi %s1777_s22, %s2269_s22   ;;  %s1714_s21 = sphi %s1775_s21, %s2268_s21   ;;  %s1710_s20 = sphi %s1773_s20, %s2267_s20   ;;  %s1706_s19 = sphi %s1771_s19, %s2266_s19   ;;  %s1702_s18 = sphi %s1769_s18, %s2265_s18  }
   0xe   : > { %p38_p0 = scmp.ne.s32.totalorder %s1722_s23, %s1718_s22  ;;  %p2217_p1 = scmp.eq.s32.totalorder %s1726_s24, 0 }
   0xf   : > { %p44_p2 = scmp.ne.s32.totalorder %s1718_s22, %s1714_s21  ;;  %p2216_p3 = scmp.eq.s32.totalorder %s1803_s25, 0 }
  0x10   : > { %p40_p4 = por %p2217_p1, %p38_p0  ;;  %p2215_p6 = scmp.lt.s32.totalorder %s1726_s24, 2 }
  0x11   : > { %p1815_p5 = por %p2216_p3, %p44_p2  ;;  %s1821_s28 = sand.u32 1, %s1722_s23  }
  0x12   : > { %s2220_s29 = sshll.u32 %s1726_s24, 7  ;;  %s2219_s30 = sshll.u32 %s1821_s28, 3 }
  0x13   : > { %s2236_s27 = scalar_select %p1815_p5, 1, 0 }
  0x14   : > { %p1827_p7 = pnand %p2215_p6, %p40_p4  ;;  %s221_s7 = sand.u32 1, %s1726_s24  }
  0x15   : > { %s2238_s1 = sld [smem:[#allocation18_spill]]  ;;  %s225_s11 = scalar_lea.vmem [#allocation4], %s2219_s30 }
  0x16   : > { %s2237_s6 = scalar_select %p1827_p7, 1, 0 }
  0x17   : > { %s232_s12 = sshll.u32 %s225_s11, 4  ;;  %s1846_s13 = scalar_lea.sflag [#allocation5], %s221_s7  ;;  %s1841_s12 = int_to_ptr.vmem [resolvable:$true] %s232_s12 }
  0x18   : > { %p1852_p10 = pneg %p1827_p7 }
  0x1a   : > { %s2239_s15 = scalar_select %p1852_p10, 1, 0 }
  0x1b   : > { %s1837_s10 = scalar_lea.hbm %s2238_s1, %s2220_s29  ;;  %s1521_s21 = scalar_lea.hbm %s2238_s1, 256 }
  0x1c   : > { %s1516_s14 = scalar_lea.hbm %s1837_s10, 128  ;;  %p1522_p13 = scmp.lt.s32.totalorder %s1837_s10, %s2238_s1 }
  0x1d   : > { %p1517_p9 = scmp.ne.s32.totalorder %s1837_s10, %s1516_s14  ;;  %p1523_p0 = scmp.lt.s32.totalorder %s1521_s21, %s1516_s14 }
  0x1f   : > { %p1519_p11 = pnand %p1852_p10, %p1517_p9  ;;  %p1524_p2 = por %p1523_p0, %p1522_p13 }
  0x21   : > { %p1520_p12 = pneg %p1519_p11 }
  0x23   : > { %p1525_p4 = pnand %p1524_p2, %p1520_p12 }
  0x25   : > { %1528 = shalt.err (!%p1525_p4)
}
  0x26   : > { %s1529_s11 = scalar_lea.vmem %s1841_s12, 128  ;;  %s1728_s26 = smov [#allocation4]  }
  0x27   : > { %p1530_p6 = scmp.ne.s32.totalorder %s1841_s12, %s1529_s11  ;;  %s1534_s16 = sshll.u32 %s1728_s26, 4  ;;  %s1535_s16 = int_to_ptr.vmem [resolvable:$false] %s1534_s16 }
  0x28   : > { %s1536_s17 = scalar_lea.vmem %s1535_s16, 256  ;;  %p1537_p3 = scmp.lt.s32.totalorder %s1841_s12, %s1535_s16 }
  0x29   : > { %p1532_p9 = pnand %p1530_p6, %p1852_p10  ;;  %p1538_p1 = scmp.lt.s32.totalorder %s1536_s17, %s1529_s11 }
  0x2b   : > { %p1533_p11 = pneg %p1532_p9  ;;  %p1539_p8 = por %p1538_p1, %p1537_p3 }
  0x2d   : > { %p1540_p5 = pnand %p1539_p8, %p1533_p11 }
  0x2f   : > { %1543 = shalt.err (!%p1540_p5)
}
  0x30   : > { %s2221_s14 = smov 64   ;;  %s2223_s21 = smov 4  }
  0x31   : > { %1408 = dma.hbm_to_vmem [thread:$0]  (!%p1827_p7), %s1837_s10, 128, %s1841_s12, %s1846_s13, %s2221_s14, %s2221_s14, %s2223_s21  }
  0x32   : > { %p305_p1 = scmp.lt.s32.totalorder %s1726_s24, 3  ;;  %s1147_s26 = sshll.u32 %s1821_s28, 8 }
  0x33   : > { %s1255_s8 = sshll.u32 %s1726_s24, 12  ;;  %p2240_p3 = scmp.ge.s32.totalorder %s1726_s24, 1 }
  0x34   : > { %s2242_s3 = sld [smem:[#allocation19_spill]]  ;;  %s268_s30 = scalar_lea.vmem [#allocation7], %s1147_s26 }
  0x35   : > { %p1883_p5 = pnand %p2240_p3, %p305_p1  ;;  %s276_s29 = sshll.u32 %s268_s30, 4  ;;  %s1892_s29 = int_to_ptr.vmem [resolvable:$true] %s276_s29 }
  0x36   : > { %s1896_s10 = scalar_lea.sflag [#allocation8], %s221_s7 }
  0x37   : > { %s2241_s9 = scalar_select %p1883_p5, 1, 0 }
  0x3a   : > { %s1890_s17 = scalar_lea.hbm %s2242_s3, %s1255_s8  ;;  %s1549_s8 = scalar_lea.hbm %s2242_s3, 8192 }
  0x3b   : > { %s1544_s12 = scalar_lea.hbm %s1890_s17, 4096  ;;  %p1550_p13 = scmp.lt.s32.totalorder %s1890_s17, %s2242_s3 }
  0x3c   : > { %p1545_p6 = scmp.ne.s32.totalorder %s1890_s17, %s1544_s12  ;;  %p1551_p0 = scmp.lt.s32.totalorder %s1549_s8, %s1544_s12 }
  0x3e   : > { %p1547_p8 = pnand %p1545_p6, %p1852_p10  ;;  %p1552_p2 = por %p1551_p0, %p1550_p13 }
  0x40   : > { %p1548_p12 = pneg %p1547_p8 }
  0x42   : > { %p1553_p4 = pnand %p1552_p2, %p1548_p12 }
  0x44   : > { %1556 = shalt.err (!%p1553_p4)
}
  0x45   : > { %s1557_s30 = scalar_lea.vmem %s1892_s29, 4096  ;;  %s1731_s7 = smov [#allocation7]  }
  0x46   : > { %p1558_p9 = scmp.ne.s32.totalorder %s1892_s29, %s1557_s30  ;;  %s1562_s14 = sshll.u32 %s1731_s7, 4  ;;  %s1563_s14 = int_to_ptr.vmem [resolvable:$false] %s1562_s14 }
  0x47   : > { %s1564_s21 = scalar_lea.vmem %s1563_s14, 8192  ;;  %p1565_p3 = scmp.lt.s32.totalorder %s1892_s29, %s1563_s14 }
  0x48   : > { %p1560_p11 = pnand %p1558_p9, %p1852_p10  ;;  %p1566_p6 = scmp.lt.s32.totalorder %s1564_s21, %s1557_s30 }
  0x4a   : > { %p1561_p1 = pneg %p1560_p11  ;;  %p1567_p8 = por %p1566_p6, %p1565_p3 }
  0x4c   : > { %p1568_p5 = pnand %p1567_p8, %p1561_p1 }
  0x4e   : > { %1571 = shalt.err (!%p1568_p5)
}
  0x4f   : > { %s2243_s26 = smov 4   ;;  %s2244_s12 = smov 64  }
  0x50   : > { %1414 = dma.hbm_to_vmem [thread:$0]  (!%p1827_p7), %s1890_s17, 4096, %s1892_s29, %s1896_s10, %s2244_s12, %s2244_s12, %s2243_s26  }
  0x51   : > { %s2245_s8 = sshll.u32 %s1726_s24, 7  ;;  %s2246_s0 = sld [smem:[#allocation17_spill]] }
  0x52   : > { %s2247_s7 = sshll.u32 %s1821_s28, 3  ;;  %s201_s1 = scalar_lea.sflag [#allocation3], %s1821_s28 }
  0x53   : > { %s204_s14 = scalar_lea.vmem [#allocation2], %s2247_s7 }
  0x54   : > { %s211_s21 = sshll.u32 %s204_s14, 4  ;;  %s1931_s21 = int_to_ptr.vmem [resolvable:$true] %s211_s21 }
  0x57   : > { %s1927_s30 = scalar_lea.hbm %s2246_s0, %s2245_s8  ;;  %s1577_s11 = scalar_lea.hbm %s2246_s0, 256 }
  0x58   : > { %s1572_s3 = scalar_lea.hbm %s1927_s30, 128  ;;  %p1578_p0 = scmp.lt.s32.totalorder %s1927_s30, %s2246_s0 }
  0x59   : > { %p1573_p5 = scmp.ne.s32.totalorder %s1927_s30, %s1572_s3  ;;  %p1579_p2 = scmp.lt.s32.totalorder %s1577_s11, %s1572_s3 }
  0x5b   : > { %p1575_p12 = pnand %p1573_p5, %p1852_p10  ;;  %p1580_p4 = por %p1579_p2, %p1578_p0 }
  0x5d   : > { %p1576_p13 = pneg %p1575_p12 }
  0x5f   : > { %p1581_p9 = pnand %p1580_p4, %p1576_p13 }
  0x61   : > { %1584 = shalt.err (!%p1581_p9)
}
  0x62   : > { %s1585_s7 = scalar_lea.vmem %s1931_s21, 128  ;;  %s1732_s14 = smov [#allocation2]  }
  0x63   : > { %p1586_p11 = scmp.ne.s32.totalorder %s1931_s21, %s1585_s7  ;;  %s1590_s29 = sshll.u32 %s1732_s14, 4  ;;  %s1591_s29 = int_to_ptr.vmem [resolvable:$false] %s1590_s29 }
  0x64   : > { %s1592_s17 = scalar_lea.vmem %s1591_s29, 256  ;;  %p1593_p6 = scmp.lt.s32.totalorder %s1931_s21, %s1591_s29 }
  0x65   : > { %p1588_p1 = pnand %p1586_p11, %p1852_p10  ;;  %p1594_p8 = scmp.lt.s32.totalorder %s1592_s17, %s1585_s7 }
  0x67   : > { %p1589_p3 = pneg %p1588_p1  ;;  %p1595_p5 = por %p1594_p8, %p1593_p6 }
  0x69   : > { %p1596_p12 = pnand %p1595_p5, %p1589_p3 }
  0x6b   : > { %1599 = shalt.err (!%p1596_p12)
}
  0x6c   : > { %1405 = dma.hbm_to_vmem [thread:$0]  (!%p1827_p7), %s1927_s30, 128, %s1931_s21, %s201_s1, %s2244_s12, %s2244_s12, %s2243_s26  }
  0x6d   : > { %s1958_s3 = sadd.s32 1, %s1726_s24   ;;  %s80_s11 = ssub.s32 1, %s1726_s24 }
  0x6e   : > { %2248 = sst [smem:[#allocation15_spill]] %s1958_s3  ;;  %s28_s8 = ssub.s32 %s1726_s24, %s1958_s3 }
  0x6f   : > { %s81_s16 = ssub.s32 1, %s1958_s3  ;;  %p29_p13 = scmp.eq.s32.totalorder %s28_s8, 0 }
  0x70   : > { %s82_s7 = ssub.s32 %s80_s11, %s81_s16  ;;  %s85_s14 = sadd.s32 1, %s1710_s20 }
  0x71   : > { %p83_p0 = scmp.eq.s32.totalorder %s82_s7, 0  ;;  %s2249_s29 = sadd.s32 1, %s1722_s23 }
  0x72   : > { %s1968_s17 = scalar_select %p29_p13, %s1722_s23, %s2249_s29  }
  0x73   : > { %s1971_s0 = scalar_select %p83_p0, %s1710_s20, %s85_s14  }
  0x74   : > { %2250 = sst [smem:[#allocation16_spill]] %s1968_s17  ;;  %p92_p2 = scmp.ne.s32.totalorder %s1710_s20, %s1706_s19 }
  0x75   : > { %p98_p4 = scmp.ne.s32.totalorder %s1706_s19, %s1702_s18  ;;  %s244_s1 = sand.u32 1, %s1710_s20  }
  0x76   : > { %s1253_s30 = sshll.u32 %s80_s11, 7  ;;  %p2251_p9 = scmp.eq.s32.totalorder %s1726_s24, 0 }
  0x77   : > { %p2252_p1 = scmp.eq.s32.totalorder %s1803_s25, 0  ;;  %s1144_s8 = sshll.u32 %s244_s1, 3 }
  0x78   : > { %p94_p11 = por %p92_p2, %p2251_p9  ;;  %s1989_s3 = scalar_lea.hbm %s2211_s2, %s1253_s30 }
  0x79   : > { %p1982_p3 = por %p98_p4, %p2252_p1  ;;  %p2254_p6 = scmp.lt.s32.totalorder %s1726_s24, 2 }
  0x7a   : > { %s246_s11 = scalar_lea.vmem [#allocation6], %s1144_s8  ;;  %s1600_s1 = scalar_lea.hbm %s1989_s3, 128 }
  0x7b   : > { %s2253_s21 = scalar_select %p1982_p3, 1, 0 }
  0x7c   : > { %p1993_p8 = pnand %p2254_p6, %p94_p11  ;;  %s254_s14 = sshll.u32 %s246_s11, 4  ;;  %s1998_s14 = int_to_ptr.vmem [resolvable:$true] %s254_s14 }
  0x7d   : > { %p1601_p5 = scmp.ne.s32.totalorder %s1989_s3, %s1600_s1  ;;  %s1605_s7 = scalar_lea.hbm %s2211_s2, 256 }
  0x7e   : > { %p1602_p12 = pneg %p1993_p8  ;;  %p1606_p2 = scmp.lt.s32.totalorder %s1989_s3, %s2211_s2 }
  0x7f   : > { %p1607_p4 = scmp.lt.s32.totalorder %s1605_s7, %s1600_s1 }
  0x80   : > { %p1603_p13 = pnand %p1602_p12, %p1601_p5 }
  0x81   : > { %p1608_p9 = por %p1607_p4, %p1606_p2 }
  0x82   : > { %p1604_p0 = pneg %p1603_p13 }
  0x84   : > { %p1609_p11 = pnand %p1608_p9, %p1604_p0 }
  0x86   : > { %1612 = shalt.err (!%p1609_p11)
}
  0x87   : > { %s1613_s8 = scalar_lea.vmem %s1998_s14, 128  ;;  %s1733_s11 = smov [#allocation6]  }
  0x88   : > { %p1614_p1 = scmp.ne.s32.totalorder %s1998_s14, %s1613_s8  ;;  %s1618_s29 = sshll.u32 %s1733_s11, 4  ;;  %s1619_s29 = int_to_ptr.vmem [resolvable:$false] %s1618_s29 }
  0x89   : > { %s1620_s30 = scalar_lea.vmem %s1619_s29, 256  ;;  %p1621_p13 = scmp.lt.s32.totalorder %s1998_s14, %s1619_s29 }
  0x8a   : > { %p1616_p6 = pnand %p1614_p1, %p1602_p12  ;;  %p1622_p3 = scmp.lt.s32.totalorder %s1620_s30, %s1613_s8 }
  0x8c   : > { %p1617_p5 = pneg %p1616_p6  ;;  %p1623_p7 = por %p1622_p3, %p1621_p13 }
  0x8e   : > { %p1624_p10 = pnand %p1623_p7, %p1617_p5 }
  0x90   : > { %1627 = shalt.err (!%p1624_p10)
}
  0x91   : > { %1411 = dma.hbm_to_vmem [thread:$0]  (!%p1993_p8), %s1989_s3, 128, %s1998_s14, %s1846_s13, %s2244_s12, %s2244_s12, %s2243_s26  }
  0x92   : > { %s1256_s23 = smul.u32 48, %s1726_s24  ;;  %p2257_p10 = scmp.ne.s32.totalorder %s2239_s15, 0 }
  0x93   : > { %s2256_s17 = smul.u32 3, %s1821_s28  ;;  %s1633_s28 = scalar_lea.hbm %s2213_s4, 96 }
  0x94   : > { %s2028_s8 = scalar_lea.hbm %s2213_s4, %s1256_s23 }
  0x95   : > { %s290_s1 = scalar_lea.vmem [#allocation9], %s2256_s17  ;;  %s1628_s18 = scalar_lea.hbm %s2028_s8, 48 }
  0x96   : > { %s297_s29 = sshll.u32 %s290_s1, 4  ;;  %p1629_p7 = scmp.ne.s32.totalorder %s2028_s8, %s1628_s18  ;;  %s2030_s29 = int_to_ptr.vmem [resolvable:$true] %s297_s29 }
  0x97   : > { %p1634_p8 = scmp.lt.s32.totalorder %s2028_s8, %s2213_s4  ;;  %p1635_p0 = scmp.lt.s32.totalorder %s1633_s28, %s1628_s18 }
  0x98   : > { %p1631_p3 = pnand %p1629_p7, %p2257_p10 }
  0x99   : > { %p1636_p2 = por %p1635_p0, %p1634_p8 }
  0x9a   : > { %p1632_p12 = pneg %p1631_p3 }
  0x9c   : > { %p1637_p4 = pnand %p1636_p2, %p1632_p12 }
  0x9e   : > { %1640 = shalt.err (!%p1637_p4)
}
  0x9f   : > { %s1641_s3 = scalar_lea.vmem %s2030_s29, 48  ;;  %s1734_s14 = smov [#allocation9]  }
  0xa0   : > { %p1642_p9 = scmp.ne.s32.totalorder %s2030_s29, %s1641_s3  ;;  %s1646_s11 = sshll.u32 %s1734_s14, 4  ;;  %s1647_s11 = int_to_ptr.vmem [resolvable:$false] %s1646_s11 }
  0xa1   : > { %s1648_s30 = scalar_lea.vmem %s1647_s11, 96  ;;  %p1649_p6 = scmp.lt.s32.totalorder %s2030_s29, %s1647_s11 }
  0xa2   : > { %p1644_p11 = pnand %p1642_p9, %p2257_p10  ;;  %p1650_p5 = scmp.lt.s32.totalorder %s1648_s30, %s1641_s3 }
  0xa4   : > { %p1645_p1 = pneg %p1644_p11  ;;  %p1651_p13 = por %p1650_p5, %p1649_p6 }
  0xa6   : > { %p1652_p7 = pnand %p1651_p13, %p1645_p1 }
  0xa8   : > { %1655 = shalt.err (!%p1652_p7)
}
  0xa9   : > { %s1735_s23 = smov 16   ;;  %s1736_s17 = smov 1  }
  0xaa   : > { %p2258_p3 = scmp.ne.s32.totalorder %s2237_s6, 0  ;;  %p2259_p10 = scmp.ne.s32.totalorder %s2241_s9, 0 }
  0xab   : > { %s2056_s15 = sand.u32 (!%p2259_p10), 1, %s1718_s22   ;;  %p2260_p12 = scmp.ne.s32.totalorder (!%p2259_p10), %s2236_s27, 0 }
  0xac   : > { %1417 = dma.hbm_to_vmem [thread:$0]  (!%p2258_p3), %s2028_s8, 48, %s2030_s29, %s1896_s10, %s1735_s23, %s1735_s23, %s1736_s17  }
  0xad   : > { %309 = sbr.rel (%p2259_p10) target bundleno = 1241 (0x4d9), region = 40  ;;  %s1153_s1 = sshll.u32 (!%p2259_p10), %s2056_s15, 3 }
  0xae   : > { %s312_s16 = scalar_lea.sflag (!%p2259_p10), [#allocation3], %s2056_s15  ;;  %s2060_s7 = scalar_lea.vmem (!%p2259_p10), [#allocation2], %s1153_s1 }
  0xb2   : > { %1685 = dma.done.wait (%p2260_p12), %s312_s16, 128  }
  0xb3   : > { %1687 = vsyncadd (%p2260_p12), %s312_s16, 4294967168  ;;  %s320_s6 = sand.u32 1, %s1803_s25   ;;  %s2067_s10 = scalar_lea.vmem [#allocation4], %s1153_s1 }
  0xb4   : > { %s321_s9 = scalar_lea.sflag [#allocation5], %s320_s6 }
  0xb5   : > { %1689 = dma.done.wait (%p2260_p12), %s321_s9, 128  }
  0xb6   : > { %1691 = vsyncadd (%p2260_p12), %s321_s9, 4294967168  ;;  %s331_s29 = sand.u32 1, %s1706_s19   ;;  %p2261_p8 = scmp.ne.s32.totalorder %s2253_s21, 0 }
  0xb7   : > { %s2074_s8 = sshll.u32 %s331_s29, 3 }
  0xb8   : > { %s333_s18 = scalar_lea.vmem [#allocation6], %s2074_s8 }
  0xb9   : > { %1693 = dma.done.wait (%p2261_p8), %s321_s9, 128  }
  0xba   : > { %1695 = vsyncadd (%p2261_p8), %s321_s9, 4294967168  ;;  %s1156_s13 = sshll.u32 %s2056_s15, 8  ;;  %s339_s24 = scalar_lea.sflag [#allocation8], %s320_s6 }
  0xbb   : > { %s2082_s28 = scalar_lea.vmem [#allocation7], %s1156_s13 }
  0xbc   : > { %1697 = dma.done.wait (%p2260_p12), %s339_s24, 4144  }
  0xbd   : > { %1699 = vsyncadd (%p2260_p12), %s339_s24, 4294963152  ;;  %v1737_v0 = vmov 0.0   ;;  %vm1738_vm0 = vmmov 0   ;;  %v1481_v1 = vld [vmem:[%s2082_s28 + $0x38] sm:$0xff]   ;;  %v1482_v2 = vld [vmem:[%s2082_s28 + $0x30] sm:$0xff]   ;;  %vm535_vm1 = vcmask 130048  }
  0xbe   : > { %1298 = vmatprep.subr.bf16.mxu0 %v1737_v0  ;;  %1314 = vmatprep.mubr.msk.bf16.mxu0 %vm1738_vm0, %v1737_v0  ;;  %v1483_v3 = vld [vmem:[%s2082_s28 + $0x28] sm:$0xff]   ;;  %v1484_v4 = vld [vmem:[%s2082_s28 + $0x20] sm:$0xff]   ;;  %v1485_v5 = vld [vmem:[%s2082_s28 + $0x18] sm:$0xff]   ;;  %s1391_s27 = smul.u32 3, %s2056_s15  ;;  %p401_p0 = scmp.lt.s32.totalorder %s1803_s25, 1 }
  0xbf   : > { %1318 = vmatprep.subr.bf16.mxu1 %v1737_v0  ;;  %1320 = vmatprep.mubr.msk.bf16.mxu1 %vm1738_vm0, %v1737_v0  ;;  %v1486_v6 = vld [vmem:[%s2082_s28 + $0x10] sm:$0xff]   ;;  %v1487_v7 = vld [vmem:[%s2082_s28 + $0x8] sm:$0xff]   ;;  %v1488_v8 = vld [vmem:[%s2082_s28] sm:$0xff]  }
  0xc0   : > { %1299 = vmatpush3.bf16.msra.mxu0 %v1481_v1  ;;  %v2110_v9 = vld [vmem:[%s2060_s7] sm:$0xff]   ;;  %v1490_v15 = vld [vmem:[%s2067_s10] sm:$0xff]   ;;  %s2138_s21 = scalar_lea.vmem [#allocation9], %s1391_s27  ;;  %s2271_s25 = smov (!%p401_p0, %s1803_s25), 1 }
  0xc1   : > { %1300 = vmatprep.subr.bf16.mxu0 %v1737_v0  ;;  %v1491_v16 = vld [vmem:[%s2082_s28 + $0x78] sm:$0xff]   ;;  %v1492_v17 = vld [vmem:[%s2082_s28 + $0x70] sm:$0xff]   ;;  %v1493_v18 = vld [vmem:[%s2082_s28 + $0x68] sm:$0xff]   ;;  %s1257_s26 = sshll.u32 %s2271_s25, 4 }
  0xc2   : > { %v1494_v19 = vld [vmem:[%s2082_s28 + $0x60] sm:$0xff]   ;;  %v1495_v20 = vld [vmem:[%s2082_s28 + $0x58] sm:$0xff]   ;;  %v1496_v21 = vld [vmem:[%s2082_s28 + $0x50] sm:$0xff]   ;;  %s405_s14 = scalar_lea.vmem %s2214_s5, %s1257_s26 }
  0xc3   : > { %v1497_v22 = vld [vmem:[%s2082_s28 + $0x48] sm:$0xff]   ;;  %v1498_v23 = vld [vmem:[%s2082_s28 + $0x40] sm:$0xff]   ;;  %v1500_v36 = vld [vmem:[%s2082_s28 + $0xf8] sm:$0xff]  }
  0xc4   : > { %1301 = vmatpush3.bf16.msra.mxu0 %v1482_v2  ;;  %v1168_v24 = vld [vmem:[%s2138_s21] ss:$0 sm:$0xff]  ;;  %v1502_v37 = vld [vmem:[%s2082_s28 + $0xf0] sm:$0xff]   ;;  %v1504_v38 = vld [vmem:[%s2082_s28 + $0xe8] sm:$0xff]  }
  0xc5   : > { %1302 = vmatprep.subr.bf16.mxu0 %v1737_v0  ;;  %v1506_v39 = vld [vmem:[%s2082_s28 + $0xe0] sm:$0xff]   ;;  %v1508_v40 = vld [vmem:[%s2082_s28 + $0xd8] sm:$0xff]   ;;  %v1503_v48 = vld [vmem:[%s2082_s28 + $0xb0] sm:$0xff]  }
  0xc6   : > { %v1499_v46 = vld [vmem:[%s333_s18] sm:$0xff]   ;;  %v1505_v49 = vld [vmem:[%s2082_s28 + $0xa8] sm:$0xff]   ;;  %v1507_v50 = vld [vmem:[%s2082_s28 + $0xa0] sm:$0xff]  }
  0xc7   : > { %v1501_v47 = vld [vmem:[%s2082_s28 + $0xb8] sm:$0xff]   ;;  %v1510_v52 = vld [vmem:[%s2082_s28 + $0xd0] sm:$0xff]   ;;  %v1512_v53 = vld [vmem:[%s2082_s28 + $0xc8] sm:$0xff]  }
  0xc8   : > { %1303 = vmatpush3.bf16.msra.mxu0 %v1483_v3  ;;  %v1509_v51 = vld [vmem:[%s2082_s28 + $0x98] sm:$0xff]   ;;  %v1511_v54 = vld [vmem:[%s2082_s28 + $0x90] sm:$0xff]   ;;  %v1514_v55 = vld [vmem:[%s2082_s28 + $0xc0] sm:$0xff]  }
  0xc9   : > { %1304 = vmatprep.subr.bf16.mxu0 %v1737_v0  ;;  %v1513_v56 = vld [vmem:[%s2082_s28 + $0x88] sm:$0xff]   ;;  %v1515_v57 = vld [vmem:[%s2082_s28 + $0x80] sm:$0xff]  }
  0xca   : > { %v1196_v58 = vld [vmem:[%s2138_s21 + $0x1] ss:$0 sm:$0xff] }
  0xcc   : > { %1305 = vmatpush3.bf16.msra.mxu0 %v1484_v4 }
  0xcd   : > { %1306 = vmatprep.subr.bf16.mxu0 %v1737_v0 }
  0xd0   : > { %1307 = vmatpush3.bf16.msra.mxu0 %v1485_v5 }
  0xd1   : > { %1308 = vmatprep.subr.bf16.mxu0 %v1737_v0 }
  0xd4   : > { %1309 = vmatpush3.bf16.msra.mxu0 %v1486_v6 }
  0xd5   : > { %1310 = vmatprep.subr.bf16.mxu0 %v1737_v0 }
  0xd8   : > { %1311 = vmatpush3.bf16.msra.mxu0 %v1487_v7 }
  0xd9   : > { %1312 = vmatprep.subr.bf16.mxu0 %v1737_v0 }
  0xdc   : > { %1313 = vmatpush3.bf16.msra.mxu0 %v1488_v8 }
  0xdd   : > { %1344 = vmatprep.subr.bf16.mxu0 %v1737_v0 }
  0xdf   : > { %1315 = vmatmul.mubr.bf16.vlgmr.msra.gmra.mxu0 %v2110_v9 }
  0xe0   : > { %1346 = vmatprep.mubr.msk.bf16.mxu0 %vm1738_vm0, %v1737_v0 }
 0x19f   : > { %v516_v10 = vpop.f32.mrf.mxu0 }
 0x1a1   : > { %v1316_v11 = vpop.f32.mrf.mxu0 }
 0x1a2   : > { %v1248_v11 = vld [vmem:[%s2138_s21 + $0x2] ss:$0 sm:$0xff] }
 0x1a3   : > { %v519_v12 = vpop.f32.mrf.mxu0 }
 0x1a4   : > { %v523_v13 = vpack.c.bf16 %v519_v12, %v516_v10 }
 0x1a5   : > { %v1317_v14 = vpop.f32.mrf.mxu0 }
 0x1a6   : > { %1319 = vmatpush3.bf16.msra.mxu1 %v523_v13 }
 0x1a7   : > { %1324 = vmatprep.subr.bf16.mxu1 %v1737_v0 }
 0x1a9   : > { %1321 = vmatmul.mubr.msk.bf16.vlgmr.msra.gmra.mxu1 %vm535_vm1, %v1490_v15 }
 0x1aa   : > { %1325 = vmatpush3.bf16.msra.mxu1 %v1491_v16  ;;  %1340 = vmatprep.mubr.msk.bf16.mxu1 %vm1738_vm0, %v1737_v0 }
 0x1ab   : > { %1326 = vmatprep.subr.bf16.mxu1 %v1737_v0 }
 0x1ae   : > { %1327 = vmatpush3.bf16.msra.mxu1 %v1492_v17 }
 0x1af   : > { %1328 = vmatprep.subr.bf16.mxu1 %v1737_v0 }
 0x1b2   : > { %1329 = vmatpush3.bf16.msra.mxu1 %v1493_v18 }
 0x1b3   : > { %1330 = vmatprep.subr.bf16.mxu1 %v1737_v0 }
 0x1b6   : > { %1331 = vmatpush3.bf16.msra.mxu1 %v1494_v19 }
 0x1b7   : > { %1332 = vmatprep.subr.bf16.mxu1 %v1737_v0 }
 0x1ba   : > { %1333 = vmatpush3.bf16.msra.mxu1 %v1495_v20 }
 0x1bb   : > { %1334 = vmatprep.subr.bf16.mxu1 %v1737_v0 }
 0x1be   : > { %1335 = vmatpush3.bf16.msra.mxu1 %v1496_v21 }
 0x1bf   : > { %1336 = vmatprep.subr.bf16.mxu1 %v1737_v0 }
 0x1c2   : > { %1337 = vmatpush3.bf16.msra.mxu1 %v1497_v22 }
 0x1c3   : > { %1338 = vmatprep.subr.bf16.mxu1 %v1737_v0 }
 0x1c6   : > { %1339 = vmatpush3.bf16.msra.mxu1 %v1498_v23 }
 0x1c7   : > { %1350 = vmatprep.subr.bf16.mxu1 %v1737_v0 }
 0x269   : > { %v573_v25 = vpop.f32.mrf.mxu1 }
 0x26a   : > { %v574_v26 = vadd.f32 %v1168_v24, %v573_v25 }
 0x26b   : > { %v1322_v27 = vpop.f32.mrf.mxu1 }
 0x26c   : > { %v580_v29 = vmul.f32 0.1, %v574_v26 }
 0x26d   : > { %v576_v28 = vpop.f32.mrf.mxu1 }
 0x26e   : > { %v577_v30 = vadd.f32 %v1168_v24, %v576_v28  ;;  %v582_v33 = vmax.f32 %v574_v26, %v580_v29 }
 0x26f   : > { %v1323_v31 = vpop.f32.mrf.mxu1 }
 0x270   : > { %v581_v32 = vmul.f32 0.1, %v577_v30 }
 0x272   : > { %v583_v34 = vmax.f32 %v577_v30, %v581_v32 }
 0x274   : > { %v584_v35 = vpack.c.bf16 %v583_v34, %v582_v33 }
 0x276   : > { %1341 = vmatmul.mubr.bf16.vlgmr.msra.gmra.mxu1 %v584_v35 }
 0x277   : > { %1366 = vmatprep.mubr.msk.bf16.mxu1 %vm1738_vm0, %v1737_v0  ;;  %1351 = vmatpush3.bf16.msra.mxu1 %v1500_v36 }
 0x278   : > { %1352 = vmatprep.subr.bf16.mxu1 %v1737_v0 }
 0x27b   : > { %1353 = vmatpush3.bf16.msra.mxu1 %v1502_v37 }
 0x27c   : > { %1354 = vmatprep.subr.bf16.mxu1 %v1737_v0 }
 0x27f   : > { %1355 = vmatpush3.bf16.msra.mxu1 %v1504_v38 }
 0x280   : > { %1356 = vmatprep.subr.bf16.mxu1 %v1737_v0 }
 0x283   : > { %1357 = vmatpush3.bf16.msra.mxu1 %v1506_v39 }
 0x284   : > { %1358 = vmatprep.subr.bf16.mxu1 %v1737_v0 }
 0x287   : > { %1359 = vmatpush3.bf16.msra.mxu1 %v1508_v40 }
 0x288   : > { %1360 = vmatprep.subr.bf16.mxu1 %v1737_v0 }
 0x28b   : > { %1361 = vmatpush3.bf16.msra.mxu1 %v1510_v52 }
 0x28c   : > { %1362 = vmatprep.subr.bf16.mxu1 %v1737_v0 }
 0x28f   : > { %1363 = vmatpush3.bf16.msra.mxu1 %v1512_v53 }
 0x290   : > { %1364 = vmatprep.subr.bf16.mxu1 %v1737_v0 }
 0x293   : > { %1365 = vmatpush3.bf16.msra.mxu1 %v1514_v55 }
 0x296   : > { %1367 = vmatmul.mubr.bf16.vlgmr.msra.gmra.mxu1 %v2110_v9 }
 0x336   : > { %v688_v41 = vpop.f32.mrf.mxu1 }
 0x338   : > { %v1342_v42 = vpop.f32.mrf.mxu1 }
 0x33a   : > { %v691_v43 = vpop.f32.mrf.mxu1 }
 0x33b   : > { %v695_v44 = vpack.c.bf16 %v691_v43, %v688_v41 }
 0x33c   : > { %v1343_v45 = vpop.f32.mrf.mxu1 }
 0x33d   : > { %1345 = vmatpush3.bf16.msra.mxu0 %v695_v44 }
 0x33e   : > { %1370 = vmatprep.subr.bf16.mxu0 %v1737_v0 }
 0x340   : > { %1347 = vmatmul.mubr.msk.bf16.vlgmr.msra.gmra.mxu0 %vm535_vm1, %v1499_v46 }
 0x341   : > { %1371 = vmatpush3.bf16.msra.mxu0 %v1501_v47  ;;  %1386 = vmatprep.mubr.msk.bf16.mxu0 %vm1738_vm0, %v1737_v0 }
 0x342   : > { %1372 = vmatprep.subr.bf16.mxu0 %v1737_v0 }
 0x345   : > { %1373 = vmatpush3.bf16.msra.mxu0 %v1503_v48 }
 0x346   : > { %1374 = vmatprep.subr.bf16.mxu0 %v1737_v0 }
 0x349   : > { %1375 = vmatpush3.bf16.msra.mxu0 %v1505_v49 }
 0x34a   : > { %1376 = vmatprep.subr.bf16.mxu0 %v1737_v0 }
 0x34d   : > { %1377 = vmatpush3.bf16.msra.mxu0 %v1507_v50 }
 0x34e   : > { %1378 = vmatprep.subr.bf16.mxu0 %v1737_v0 }
 0x351   : > { %1379 = vmatpush3.bf16.msra.mxu0 %v1509_v51 }
 0x352   : > { %1380 = vmatprep.subr.bf16.mxu0 %v1737_v0 }
 0x355   : > { %1381 = vmatpush3.bf16.msra.mxu0 %v1511_v54 }
 0x356   : > { %1382 = vmatprep.subr.bf16.mxu0 %v1737_v0 }
 0x359   : > { %1383 = vmatpush3.bf16.msra.mxu0 %v1513_v56 }
 0x35a   : > { %1384 = vmatprep.subr.bf16.mxu0 %v1737_v0  ;;  %v872_v0 = vpop.f32.mrf.mxu1 }
 0x35c   : > { %v1368_v7 = vpop.f32.mrf.mxu1 }
 0x35d   : > { %1385 = vmatpush3.bf16.msra.mxu0 %v1515_v57 }
 0x35e   : > { %v875_v8 = vpop.f32.mrf.mxu1 }
 0x360   : > { %v1369_v9 = vpop.f32.mrf.mxu1 }
 0x400   : > { %v744_v59 = vpop.f32.mrf.mxu0 }
 0x401   : > { %v745_v60 = vadd.f32 %v1196_v58, %v744_v59 }
 0x402   : > { %v1348_v61 = vpop.f32.mrf.mxu0 }
 0x403   : > { %v751_v63 = vmul.f32 0.1, %v745_v60 }
 0x404   : > { %v747_v62 = vpop.f32.mrf.mxu0 }
 0x405   : > { %v748_v1 = vadd.f32 %v1196_v58, %v747_v62  ;;  %v753_v4 = vmax.f32 %v745_v60, %v751_v63 }
 0x406   : > { %v1349_v2 = vpop.f32.mrf.mxu0 }
 0x407   : > { %v752_v3 = vmul.f32 0.1, %v748_v1 }
 0x409   : > { %v754_v5 = vmax.f32 %v748_v1, %v752_v3 }
 0x40b   : > { %v755_v6 = vpack.c.bf16 %v754_v5, %v753_v4 }
 0x40d   : > { %1387 = vmatmul.mubr.bf16.vlgmr.msra.gmra.mxu0 %v755_v6 }
 0x4cd   : > { %v961_v10 = vpop.f32.mrf.mxu0 }
 0x4ce   : > { %v962_v12 = vadd.f32 %v961_v10, %v872_v0 }
 0x4cf   : > { %v1388_v13 = vpop.f32.mrf.mxu0 }
 0x4d0   : > { %v976_v14 = vadd.f32 %v1248_v11, %v962_v12 }
 0x4d1   : > { %v964_v15 = vpop.f32.mrf.mxu0 }
 0x4d2   : > { %v978_v16 = vmax.f32 %v976_v14, 0.0  ;;  %v965_v17 = vadd.f32 %v964_v15, %v875_v8 }
 0x4d3   : > { %v1389_v18 = vpop.f32.mrf.mxu0 }
 0x4d4   : > { %980 = vst [vmem:[%s405_s14] sm:$0xff] %v978_v16  ;;  %v977_v19 = vadd.f32 %v1248_v11, %v965_v17 }
 0x4d6   : > { %v979_v20 = vmax.f32 %v977_v19, 0.0 }
 0x4d8   : > { %981 = vst [vmem:[%s405_s14 + $0x8] sm:$0xff] %v979_v20 }
 0x4d9 PF: > { %s2262_s24 = sld [smem:[#allocation15_spill]]  ;;  %s2265_s18 = smov %s1706_s19 }
 0x4da   : > { %s2263_s25 = sld [smem:[#allocation14_spill]]  ;;  %s2266_s19 = smov %s1710_s20 }
 0x4db   : > { %s2264_s23 = sld [smem:[#allocation16_spill]]  ;;  %s2267_s20 = smov %s1971_s0 }
 0x4dc   : > { %s2268_s21 = smov %s1718_s22 }
 0x4df   : > { %p21_p2 = scmp.ge.s32.totalorder %s2262_s24, 4  }
 0x4e0   : > { %s2269_s22 = smov %s2263_s25 }
 0x4e1   :  { %23 = sbr.rel (!%p21_p2) target bundleno = 13 (0xd), region = 133 }
 0x4e6   :  { %1003 = vsyncpa [#allocation3], 1 }
 0x4e7   :  { %1005 = vsyncpa [#allocation3 + $0x1], 1 }
 0x4e8   :  { %1006 = vsyncpa [#allocation5], 1 }
 0x4e9   :  { %1008 = vsyncpa [#allocation5 + $0x1], 1 }
 0x4ea   :  { %1009 = vsyncpa [#allocation8], 1 }
 0x4eb   :  { %1011 = vsyncpa [#allocation8 + $0x1], 1 }

</bundles_post_ra>
